<compile_context>
chip_gen: v5e
topology: v5e:2x2
jax: 0.10.0
libtpu: 0.0.40
codegen_flags: <defaults>
</compile_context>

<pallas_src>
import functools

import numpy as np
import jax
import jax.numpy as jnp
from jax import lax
from jax.experimental import pallas as pl
from jax.experimental.pallas import tpu as pltpu

EPS = 1e-5          # nn.InstanceNorm2d default
NEG_SLOPE = 0.01    # nn.LeakyReLU default


# ----------------------------------------------------------------------------
# Kernel 1: separable bilinear 2x upsample + InstanceNorm + LeakyReLU
# ----------------------------------------------------------------------------
def _up_norm_lrelu_kernel(x_ref, awt_ref, ah_ref, o_ref):
    """x_ref: (1, C*H, W), awt: (W, 2W), ah: (2H, H), o_ref: (1, C, 2H, 2W)."""
    _, C, H2, W2 = o_ref.shape
    H = x_ref.shape[1] // C
    inv_hw = 1.0 / float(H2 * W2)

    # W-axis upsample for all channels at once: (C*H, W) @ (W, W2).
    t = jnp.dot(x_ref[0], awt_ref[...], preferred_element_type=jnp.float32)

    # H-axis upsample per channel (left multiply by Ah), fused with
    # InstanceNorm (one-pass variance) and LeakyReLU.
    # TODO(synk): for large C switch this static unroll to a channel grid axis.
    for c in range(C):
        u = jnp.dot(ah_ref[...], t[c * H:(c + 1) * H, :],
                    preferred_element_type=jnp.float32)          # (H2, W2)
        s1 = jnp.sum(jnp.sum(u, axis=-1, keepdims=True), axis=0, keepdims=True)
        s2 = jnp.sum(jnp.sum(u * u, axis=-1, keepdims=True), axis=0,
                     keepdims=True)
        mean = s1 * inv_hw
        var = jnp.maximum(s2 * inv_hw - mean * mean, 0.0)
        y = (u - mean) * lax.rsqrt(var + EPS)
        o_ref[0, c] = jnp.where(y > 0, y, NEG_SLOPE * y)


# ----------------------------------------------------------------------------
# Kernel 2: [refl-pad + conv3x3] + InstanceNorm + LeakyReLU + [refl-pad + conv3x3]
# ----------------------------------------------------------------------------
def _fill_taps(a, patch_ref, col0, col_last, row0, row_last, C, W2):
    """Write the 9 ReflectionPad(1) 3x3 taps of `a` (C, S) into patch_ref (9C, S).

    `a` is row-major flattened over (H2, W2); tap (dr, dc) at output position
    s = i*W2 + j must read a[c, reflect(i+dr), reflect(j+dc)].  Shifts are
    circular lane rolls; edge masks fix both the row wrap-around and the
    reflection at the image borders.  Row k*C + c of patch_ref pairs with
    column k*Cin + c of the packed conv weight, k = (dr+1)*3 + (dc+1).
    """
    a_e = jnp.roll(a, -1, axis=1)      # a[c, s+1]  -> column j+1
    a_w = jnp.roll(a, 1, axis=1)       # a[c, s-1]  -> column j-1
    col_shift = {
        -1: jnp.where(col0, a_e, a_w),         # j-1, reflected at j == 0
        0: a,
        1: jnp.where(col_last, a_w, a_e),      # j+1, reflected at j == W2-1
    }
    for dc in (-1, 0, 1):
        base = col_shift[dc]
        b_s = jnp.roll(base, -W2, axis=1)      # row i+1
        b_n = jnp.roll(base, W2, axis=1)       # row i-1
        row_shift = {
            -1: jnp.where(row0, b_s, b_n),        # i-1, reflected at i == 0
            0: base,
            1: jnp.where(row_last, b_n, b_s),     # i+1, reflected at i == H2-1
        }
        for dr in (-1, 0, 1):
            k = (dr + 1) * 3 + (dc + 1)
            patch_ref[k * C:(k + 1) * C, :] = row_shift[dr]


def _conv_norm_conv_kernel(a_ref, edge_ref, w1_ref, w2_ref, o_ref, patch_ref,
                           *, W2):
    """Fused conv1 + InstanceNorm + LeakyReLU + conv2 for one batch sample."""
    C = a_ref.shape[1]
    col0 = edge_ref[0:1, :] != 0
    col_last = edge_ref[1:2, :] != 0
    row0 = edge_ref[2:3, :] != 0
    row_last = edge_ref[3:4, :] != 0

    a1 = a_ref[0]                                                # (C, S)
    _fill_taps(a1, patch_ref, col0, col_last, row0, row_last, C, W2)
    h = jnp.dot(w1_ref[...], patch_ref[...],
                preferred_element_type=jnp.float32)              # (C, S)

    mean = jnp.mean(h, axis=-1, keepdims=True)
    var = jnp.maximum(jnp.mean(h * h, axis=-1, keepdims=True) - mean * mean,
                      0.0)
    h = (h - mean) * lax.rsqrt(var + EPS)
    a2 = jnp.where(h > 0, h, NEG_SLOPE * h)

    _fill_taps(a2, patch_ref, col0, col_last, row0, row_last, C, W2)
    o_ref[0] = jnp.dot(w2_ref[...], patch_ref[...],
                       preferred_element_type=jnp.float32)       # (Cout, S)


# ----------------------------------------------------------------------------
# pallas_call wrappers
# ----------------------------------------------------------------------------
def up_norm_lrelu(x, awt, ah):
    N, C, H, W = x.shape
    H2, W2 = 2 * H, 2 * W
    x2d = x.reshape(N, C * H, W)                  # free metadata reshape
    return pl.pallas_call(
        _up_norm_lrelu_kernel,
        out_shape=jax.ShapeDtypeStruct((N, C, H2, W2), jnp.float32),
        grid=(N,),
        in_specs=[
            pl.BlockSpec((1, C * H, W), lambda n: (n, 0, 0)),
            pl.BlockSpec((W, W2), lambda n: (0, 0)),
            pl.BlockSpec((H2, H), lambda n: (0, 0)),
        ],
        out_specs=pl.BlockSpec((1, C, H2, W2), lambda n: (n, 0, 0, 0)),
        compiler_params=pltpu.CompilerParams(
            dimension_semantics=("parallel",)),
    )(x2d, awt, ah)


def conv_norm_conv(act1_flat, edge, w1p, w2p, W2):
    N, C, S = act1_flat.shape
    Cout = w2p.shape[0]
    kern = functools.partial(_conv_norm_conv_kernel, W2=W2)
    return pl.pallas_call(
        kern,
        out_shape=jax.ShapeDtypeStruct((N, Cout, S), jnp.float32),
        grid=(N,),
        in_specs=[
            pl.BlockSpec((1, C, S), lambda n: (n, 0, 0)),
            pl.BlockSpec((4, S), lambda n: (0, 0)),
            pl.BlockSpec((C, 9 * C), lambda n: (0, 0)),
            pl.BlockSpec((Cout, 9 * C), lambda n: (0, 0)),
        ],
        out_specs=pl.BlockSpec((1, Cout, S), lambda n: (n, 0, 0)),
        scratch_shapes=[pltpu.VMEM((9 * C, S), jnp.float32)],
        compiler_params=pltpu.CompilerParams(
            dimension_semantics=("parallel",)),
    )(act1_flat, edge, w1p, w2p)


# ----------------------------------------------------------------------------
# Plain-JAX / numpy glue (parameter / constant preprocessing)
# ----------------------------------------------------------------------------
def _bilinear_matrix_1d(n_in, scale=2):
    """PyTorch bilinear, align_corners=False, as an (n_out, n_in) matrix."""
    n_out = n_in * scale
    A = np.zeros((n_out, n_in), np.float32)
    for i in range(n_out):
        src = max((i + 0.5) / scale - 0.5, 0.0)
        i0 = min(int(np.floor(src)), n_in - 1)
        i1 = min(i0 + 1, n_in - 1)
        lam = src - i0
        A[i, i0] += 1.0 - lam
        A[i, i1] += lam
    return A


def _edge_masks(H2, W2):
    """(4, H2*W2) int32: rows = [col==0, col==W2-1, row==0, row==H2-1]."""
    s = np.arange(H2 * W2)
    col = s % W2
    row = s // W2
    return np.stack([col == 0, col == W2 - 1,
                     row == 0, row == H2 - 1]).astype(np.int32)


def _pack_conv_weight(w):
    """(Cout, Cin, 3, 3) -> (Cout, 9*Cin), column index k*Cin + c, k=di*3+dj."""
    cout, cin = w.shape[0], w.shape[1]
    return jnp.transpose(w, (0, 2, 3, 1)).reshape(cout, 9 * cin)


def _spectral_normalize(w, key, n_power_iterations=1):
    """nn.utils.spectral_norm on a conv weight (parameter preprocessing).

    TODO(synk): PyTorch persists the power-iteration vector u across forward
    passes; here a fresh u (fixed seed) with one iteration is used.
    """
    cout = w.shape[0]
    wm = w.reshape(cout, -1)
    u = jax.random.normal(key, (cout,), jnp.float32)
    u = u / (jnp.linalg.norm(u) + 1e-12)
    v = None
    for _ in range(n_power_iterations):
        v = wm.T @ u
        v = v / (jnp.linalg.norm(v) + 1e-12)
        u = wm @ v
        u = u / (jnp.linalg.norm(u) + 1e-12)
    sigma = u @ (wm @ v)
    return w / sigma


def up_block_forward(x, w1_sn, w2_sn):
    """Forward of UpBlock.  x: (N, Cin, H, W) -> (N, Cout, 2H, 2W)."""
    N, C, H, W = x.shape
    H2, W2 = 2 * H, 2 * W

    awt = jnp.asarray(_bilinear_matrix_1d(W).T)      # (W, W2)
    ah = jnp.asarray(_bilinear_matrix_1d(H))         # (H2, H)
    edge = jnp.asarray(_edge_masks(H2, W2))          # (4, H2*W2)

    # upsample + norm1 + LeakyReLU  (kernel 1)
    act1 = up_norm_lrelu(x, awt, ah)                 # (N, C, H2, W2)
    act1_flat = act1.reshape(N, C, H2 * W2)          # free metadata reshape

    # conv1 + norm2 + LeakyReLU + conv2  (kernel 2, taps built in VMEM)
    out_flat = conv_norm_conv(act1_flat, edge,
                              _pack_conv_weight(w1_sn),
                              _pack_conv_weight(w2_sn), W2)
    return out_flat.reshape(N, -1, H2, W2)


# ----------------------------------------------------------------------------
if __name__ == "__main__":
    N, C_IN, H, W = 2, 4, 16, 16
    C_OUT = 8

    key = jax.random.PRNGKey(0)
    k_x, k_w1, k_w2, k_u1, k_u2 = jax.random.split(key, 5)

    x = jax.random.normal(k_x, (N, C_IN, H, W), jnp.float32)
    w1 = jax.random.normal(k_w1, (C_IN, C_IN, 3, 3), jnp.float32) * 0.2
    w2 = jax.random.normal(k_w2, (C_OUT, C_IN, 3, 3), jnp.float32) * 0.2

    # spectral_norm (1 power iteration, as in PyTorch's per-forward update)
    w1_sn = _spectral_normalize(w1, k_u1)
    w2_sn = _spectral_normalize(w2, k_u2)

    out = jax.block_until_ready(up_block_forward(x, w1_sn, w2_sn))

    assert out.shape == (N, C_OUT, 2 * H, 2 * W), out.shape
    assert bool(jnp.all(jnp.isfinite(out)))
    print("KERNEL_OK")
</pallas_src>

<mosaic_0001>
module attributes {stable_mosaic.version = 11 : i64} {
  func.func @_up_norm_lrelu_kernel(%arg0: i32, %arg1: memref<1x64x16xf32, #tpu.memory_space<vmem>>, %arg2: memref<16x32xf32, #tpu.memory_space<vmem>>, %arg3: memref<32x16xf32, #tpu.memory_space<vmem>>, %arg4: memref<1x4x32x32xf32, #tpu.memory_space<vmem>>) attributes {dimension_semantics = [#tpu.dimension_semantics<parallel>], iteration_bounds = array<i64: 2>, scalar_prefetch = 0 : i64, scratch_operands = 0 : i64, tpu.core_type = #tpu.core_type<tc>, window_params = [{transform_indices = @transform_0, window_bounds = array<i64: 1, 64, 16>}, {pipeline_mode = #tpu.pipeline_mode<synchronous>, transform_indices = @transform_1, window_bounds = array<i64: 16, 32>}, {pipeline_mode = #tpu.pipeline_mode<synchronous>, transform_indices = @transform_2, window_bounds = array<i64: 32, 16>}, {transform_indices = @transform_3, window_bounds = array<i64: 1, 4, 32, 32>}]} {
    %c0 = arith.constant 0 : index
    %c0_0 = arith.constant 0 : index
    %c0_1 = arith.constant 0 : index
    %0 = vector.load %arg1[%c0, %c0_0, %c0_1] : memref<1x64x16xf32, #tpu.memory_space<vmem>>, vector<1x64x16xf32>
    %1 = vector.shape_cast %0 : vector<1x64x16xf32> to vector<64x16xf32>
    %c0_2 = arith.constant 0 : index
    %c0_3 = arith.constant 0 : index
    %2 = vector.load %arg2[%c0_2, %c0_3] : memref<16x32xf32, #tpu.memory_space<vmem>>, vector<16x32xf32>
    %cst = arith.constant dense<0.000000e+00> : vector<64x32xf32>
    %3 = tpu.matmul %1, %2, %cst {dimension_numbers = #tpu.dot_dimension_numbers<[1], [0], [0], [1], [0, 0, 1, 1], [], []>} : vector<64x16xf32>, vector<16x32xf32>, vector<64x32xf32> -> vector<64x32xf32>
    %c0_4 = arith.constant 0 : index
    %c0_5 = arith.constant 0 : index
    %4 = vector.load %arg3[%c0_4, %c0_5] : memref<32x16xf32, #tpu.memory_space<vmem>>, vector<32x16xf32>
    %5 = vector.extract_strided_slice %3 {offsets = [0, 0], sizes = [16, 32], strides = [1, 1]} : vector<64x32xf32> to vector<16x32xf32>
    %cst_6 = arith.constant dense<0.000000e+00> : vector<32x32xf32>
    %6 = tpu.matmul %4, %5, %cst_6 {dimension_numbers = #tpu.dot_dimension_numbers<[1], [0], [0], [1], [0, 0, 1, 1], [], []>} : vector<32x16xf32>, vector<16x32xf32>, vector<32x32xf32> -> vector<32x32xf32>
    %cst_7 = arith.constant dense<0.000000e+00> : vector<32xf32>
    %7 = vector.multi_reduction <add>, %6, %cst_7 [1] : vector<32x32xf32> to vector<32xf32>
    %8 = vector.shape_cast %7 : vector<32xf32> to vector<32x1xf32>
    %cst_8 = arith.constant dense<0.000000e+00> : vector<1xf32>
    %9 = vector.multi_reduction <add>, %8, %cst_8 [0] : vector<32x1xf32> to vector<1xf32>
    %10 = vector.shape_cast %9 : vector<1xf32> to vector<1x1xf32>
    %11 = arith.mulf %6, %6 : vector<32x32xf32>
    %cst_9 = arith.constant dense<0.000000e+00> : vector<32xf32>
    %12 = vector.multi_reduction <add>, %11, %cst_9 [1] : vector<32x32xf32> to vector<32xf32>
    %13 = vector.shape_cast %12 : vector<32xf32> to vector<32x1xf32>
    %cst_10 = arith.constant dense<0.000000e+00> : vector<1xf32>
    %14 = vector.multi_reduction <add>, %13, %cst_10 [0] : vector<32x1xf32> to vector<1xf32>
    %15 = vector.shape_cast %14 : vector<1xf32> to vector<1x1xf32>
    %cst_11 = arith.constant 9.765625E-4 : f32
    %16 = vector.broadcast %cst_11 : f32 to vector<1x1xf32>
    %17 = arith.mulf %10, %16 : vector<1x1xf32>
    %cst_12 = arith.constant 9.765625E-4 : f32
    %18 = vector.broadcast %cst_12 : f32 to vector<1x1xf32>
    %19 = arith.mulf %15, %18 : vector<1x1xf32>
    %20 = arith.mulf %17, %17 : vector<1x1xf32>
    %21 = arith.subf %19, %20 : vector<1x1xf32>
    %cst_13 = arith.constant 0.000000e+00 : f32
    %22 = vector.broadcast %cst_13 : f32 to vector<1x1xf32>
    %23 = arith.maximumf %21, %22 : vector<1x1xf32>
    %24 = vector.broadcast %17 : vector<1x1xf32> to vector<32x32xf32>
    %25 = arith.subf %6, %24 : vector<32x32xf32>
    %cst_14 = arith.constant 9.99999974E-6 : f32
    %26 = vector.broadcast %cst_14 : f32 to vector<1x1xf32>
    %27 = arith.addf %23, %26 : vector<1x1xf32>
    %28 = math.rsqrt %27 : vector<1x1xf32>
    %29 = vector.broadcast %28 : vector<1x1xf32> to vector<32x32xf32>
    %30 = arith.mulf %25, %29 : vector<32x32xf32>
    %cst_15 = arith.constant 0.000000e+00 : f32
    %31 = vector.broadcast %cst_15 : f32 to vector<32x32xf32>
    %32 = arith.cmpf ogt, %30, %31 : vector<32x32xf32>
    %cst_16 = arith.constant 0.00999999977 : f32
    %33 = vector.broadcast %cst_16 : f32 to vector<32x32xf32>
    %34 = arith.mulf %33, %30 : vector<32x32xf32>
    %35 = arith.select %32, %30, %34 : vector<32x32xi1>, vector<32x32xf32>
    %c0_17 = arith.constant 0 : index
    %c0_18 = arith.constant 0 : index
    %c0_19 = arith.constant 0 : index
    %c0_20 = arith.constant 0 : index
    %36 = vector.load %arg4[%c0_17, %c0_18, %c0_19, %c0_20] : memref<1x4x32x32xf32, #tpu.memory_space<vmem>>, vector<1x1x32x32xf32>
    %37 = vector.shape_cast %36 : vector<1x1x32x32xf32> to vector<32x32xf32>
    %38 = vector.shape_cast %35 : vector<32x32xf32> to vector<1x1x32x32xf32>
    tpu.vector_store %arg4[%c0_17, %c0_18, %c0_19, %c0_20], %38 {strides = array<i32>} : memref<1x4x32x32xf32, #tpu.memory_space<vmem>>, vector<1x1x32x32xf32>,
    %c0_21 = arith.constant 0 : index
    %c0_22 = arith.constant 0 : index
    %39 = vector.load %arg3[%c0_21, %c0_22] : memref<32x16xf32, #tpu.memory_space<vmem>>, vector<32x16xf32>
    %40 = vector.extract_strided_slice %3 {offsets = [16, 0], sizes = [16, 32], strides = [1, 1]} : vector<64x32xf32> to vector<16x32xf32>
    %cst_23 = arith.constant dense<0.000000e+00> : vector<32x32xf32>
    %41 = tpu.matmul %39, %40, %cst_23 {dimension_numbers = #tpu.dot_dimension_numbers<[1], [0], [0], [1], [0, 0, 1, 1], [], []>} : vector<32x16xf32>, vector<16x32xf32>, vector<32x32xf32> -> vector<32x32xf32>
    %cst_24 = arith.constant dense<0.000000e+00> : vector<32xf32>
    %42 = vector.multi_reduction <add>, %41, %cst_24 [1] : vector<32x32xf32> to vector<32xf32>
    %43 = vector.shape_cast %42 : vector<32xf32> to vector<32x1xf32>
    %cst_25 = arith.constant dense<0.000000e+00> : vector<1xf32>
    %44 = vector.multi_reduction <add>, %43, %cst_25 [0] : vector<32x1xf32> to vector<1xf32>
    %45 = vector.shape_cast %44 : vector<1xf32> to vector<1x1xf32>
    %46 = arith.mulf %41, %41 : vector<32x32xf32>
    %cst_26 = arith.constant dense<0.000000e+00> : vector<32xf32>
    %47 = vector.multi_reduction <add>, %46, %cst_26 [1] : vector<32x32xf32> to vector<32xf32>
    %48 = vector.shape_cast %47 : vector<32xf32> to vector<32x1xf32>
    %cst_27 = arith.constant dense<0.000000e+00> : vector<1xf32>
    %49 = vector.multi_reduction <add>, %48, %cst_27 [0] : vector<32x1xf32> to vector<1xf32>
    %50 = vector.shape_cast %49 : vector<1xf32> to vector<1x1xf32>
    %cst_28 = arith.constant 9.765625E-4 : f32
    %51 = vector.broadcast %cst_28 : f32 to vector<1x1xf32>
    %52 = arith.mulf %45, %51 : vector<1x1xf32>
    %cst_29 = arith.constant 9.765625E-4 : f32
    %53 = vector.broadcast %cst_29 : f32 to vector<1x1xf32>
    %54 = arith.mulf %50, %53 : vector<1x1xf32>
    %55 = arith.mulf %52, %52 : vector<1x1xf32>
    %56 = arith.subf %54, %55 : vector<1x1xf32>
    %cst_30 = arith.constant 0.000000e+00 : f32
    %57 = vector.broadcast %cst_30 : f32 to vector<1x1xf32>
    %58 = arith.maximumf %56, %57 : vector<1x1xf32>
    %59 = vector.broadcast %52 : vector<1x1xf32> to vector<32x32xf32>
    %60 = arith.subf %41, %59 : vector<32x32xf32>
    %cst_31 = arith.constant 9.99999974E-6 : f32
    %61 = vector.broadcast %cst_31 : f32 to vector<1x1xf32>
    %62 = arith.addf %58, %61 : vector<1x1xf32>
    %63 = math.rsqrt %62 : vector<1x1xf32>
    %64 = vector.broadcast %63 : vector<1x1xf32> to vector<32x32xf32>
    %65 = arith.mulf %60, %64 : vector<32x32xf32>
    %cst_32 = arith.constant 0.000000e+00 : f32
    %66 = vector.broadcast %cst_32 : f32 to vector<32x32xf32>
    %67 = arith.cmpf ogt, %65, %66 : vector<32x32xf32>
    %cst_33 = arith.constant 0.00999999977 : f32
    %68 = vector.broadcast %cst_33 : f32 to vector<32x32xf32>
    %69 = arith.mulf %68, %65 : vector<32x32xf32>
    %70 = arith.select %67, %65, %69 : vector<32x32xi1>, vector<32x32xf32>
    %c0_34 = arith.constant 0 : index
    %c1 = arith.constant 1 : index
    %c0_35 = arith.constant 0 : index
    %c0_36 = arith.constant 0 : index
    %71 = vector.load %arg4[%c0_34, %c1, %c0_35, %c0_36] : memref<1x4x32x32xf32, #tpu.memory_space<vmem>>, vector<1x1x32x32xf32>
    %72 = vector.shape_cast %71 : vector<1x1x32x32xf32> to vector<32x32xf32>
    %73 = vector.shape_cast %70 : vector<32x32xf32> to vector<1x1x32x32xf32>
    tpu.vector_store %arg4[%c0_34, %c1, %c0_35, %c0_36], %73 {strides = array<i32>} : memref<1x4x32x32xf32, #tpu.memory_space<vmem>>, vector<1x1x32x32xf32>,
    %c0_37 = arith.constant 0 : index
    %c0_38 = arith.constant 0 : index
    %74 = vector.load %arg3[%c0_37, %c0_38] : memref<32x16xf32, #tpu.memory_space<vmem>>, vector<32x16xf32>
    %75 = vector.extract_strided_slice %3 {offsets = [32, 0], sizes = [16, 32], strides = [1, 1]} : vector<64x32xf32> to vector<16x32xf32>
    %cst_39 = arith.constant dense<0.000000e+00> : vector<32x32xf32>
    %76 = tpu.matmul %74, %75, %cst_39 {dimension_numbers = #tpu.dot_dimension_numbers<[1], [0], [0], [1], [0, 0, 1, 1], [], []>} : vector<32x16xf32>, vector<16x32xf32>, vector<32x32xf32> -> vector<32x32xf32>
    %cst_40 = arith.constant dense<0.000000e+00> : vector<32xf32>
    %77 = vector.multi_reduction <add>, %76, %cst_40 [1] : vector<32x32xf32> to vector<32xf32>
    %78 = vector.shape_cast %77 : vector<32xf32> to vector<32x1xf32>
    %cst_41 = arith.constant dense<0.000000e+00> : vector<1xf32>
    %79 = vector.multi_reduction <add>, %78, %cst_41 [0] : vector<32x1xf32> to vector<1xf32>
    %80 = vector.shape_cast %79 : vector<1xf32> to vector<1x1xf32>
    %81 = arith.mulf %76, %76 : vector<32x32xf32>
    %cst_42 = arith.constant dense<0.000000e+00> : vector<32xf32>
    %82 = vector.multi_reduction <add>, %81, %cst_42 [1] : vector<32x32xf32> to vector<32xf32>
    %83 = vector.shape_cast %82 : vector<32xf32> to vector<32x1xf32>
    %cst_43 = arith.constant dense<0.000000e+00> : vector<1xf32>
    %84 = vector.multi_reduction <add>, %83, %cst_43 [0] : vector<32x1xf32> to vector<1xf32>
    %85 = vector.shape_cast %84 : vector<1xf32> to vector<1x1xf32>
    %cst_44 = arith.constant 9.765625E-4 : f32
    %86 = vector.broadcast %cst_44 : f32 to vector<1x1xf32>
    %87 = arith.mulf %80, %86 : vector<1x1xf32>
    %cst_45 = arith.constant 9.765625E-4 : f32
    %88 = vector.broadcast %cst_45 : f32 to vector<1x1xf32>
    %89 = arith.mulf %85, %88 : vector<1x1xf32>
    %90 = arith.mulf %87, %87 : vector<1x1xf32>
    %91 = arith.subf %89, %90 : vector<1x1xf32>
    %cst_46 = arith.constant 0.000000e+00 : f32
    %92 = vector.broadcast %cst_46 : f32 to vector<1x1xf32>
    %93 = arith.maximumf %91, %92 : vector<1x1xf32>
    %94 = vector.broadcast %87 : vector<1x1xf32> to vector<32x32xf32>
    %95 = arith.subf %76, %94 : vector<32x32xf32>
    %cst_47 = arith.constant 9.99999974E-6 : f32
    %96 = vector.broadcast %cst_47 : f32 to vector<1x1xf32>
    %97 = arith.addf %93, %96 : vector<1x1xf32>
    %98 = math.rsqrt %97 : vector<1x1xf32>
    %99 = vector.broadcast %98 : vector<1x1xf32> to vector<32x32xf32>
    %100 = arith.mulf %95, %99 : vector<32x32xf32>
    %cst_48 = arith.constant 0.000000e+00 : f32
    %101 = vector.broadcast %cst_48 : f32 to vector<32x32xf32>
    %102 = arith.cmpf ogt, %100, %101 : vector<32x32xf32>
    %cst_49 = arith.constant 0.00999999977 : f32
    %103 = vector.broadcast %cst_49 : f32 to vector<32x32xf32>
    %104 = arith.mulf %103, %100 : vector<32x32xf32>
    %105 = arith.select %102, %100, %104 : vector<32x32xi1>, vector<32x32xf32>
    %c0_50 = arith.constant 0 : index
    %c2 = arith.constant 2 : index
    %c0_51 = arith.constant 0 : index
    %c0_52 = arith.constant 0 : index
    %106 = vector.load %arg4[%c0_50, %c2, %c0_51, %c0_52] : memref<1x4x32x32xf32, #tpu.memory_space<vmem>>, vector<1x1x32x32xf32>
    %107 = vector.shape_cast %106 : vector<1x1x32x32xf32> to vector<32x32xf32>
    %108 = vector.shape_cast %105 : vector<32x32xf32> to vector<1x1x32x32xf32>
    tpu.vector_store %arg4[%c0_50, %c2, %c0_51, %c0_52], %108 {strides = array<i32>} : memref<1x4x32x32xf32, #tpu.memory_space<vmem>>, vector<1x1x32x32xf32>,
    %c0_53 = arith.constant 0 : index
    %c0_54 = arith.constant 0 : index
    %109 = vector.load %arg3[%c0_53, %c0_54] : memref<32x16xf32, #tpu.memory_space<vmem>>, vector<32x16xf32>
    %110 = vector.extract_strided_slice %3 {offsets = [48, 0], sizes = [16, 32], strides = [1, 1]} : vector<64x32xf32> to vector<16x32xf32>
    %cst_55 = arith.constant dense<0.000000e+00> : vector<32x32xf32>
    %111 = tpu.matmul %109, %110, %cst_55 {dimension_numbers = #tpu.dot_dimension_numbers<[1], [0], [0], [1], [0, 0, 1, 1], [], []>} : vector<32x16xf32>, vector<16x32xf32>, vector<32x32xf32> -> vector<32x32xf32>
    %cst_56 = arith.constant dense<0.000000e+00> : vector<32xf32>
    %112 = vector.multi_reduction <add>, %111, %cst_56 [1] : vector<32x32xf32> to vector<32xf32>
    %113 = vector.shape_cast %112 : vector<32xf32> to vector<32x1xf32>
    %cst_57 = arith.constant dense<0.000000e+00> : vector<1xf32>
    %114 = vector.multi_reduction <add>, %113, %cst_57 [0] : vector<32x1xf32> to vector<1xf32>
    %115 = vector.shape_cast %114 : vector<1xf32> to vector<1x1xf32>
    %116 = arith.mulf %111, %111 : vector<32x32xf32>
    %cst_58 = arith.constant dense<0.000000e+00> : vector<32xf32>
    %117 = vector.multi_reduction <add>, %116, %cst_58 [1] : vector<32x32xf32> to vector<32xf32>
    %118 = vector.shape_cast %117 : vector<32xf32> to vector<32x1xf32>
    %cst_59 = arith.constant dense<0.000000e+00> : vector<1xf32>
    %119 = vector.multi_reduction <add>, %118, %cst_59 [0] : vector<32x1xf32> to vector<1xf32>
    %120 = vector.shape_cast %119 : vector<1xf32> to vector<1x1xf32>
    %cst_60 = arith.constant 9.765625E-4 : f32
    %121 = vector.broadcast %cst_60 : f32 to vector<1x1xf32>
    %122 = arith.mulf %115, %121 : vector<1x1xf32>
    %cst_61 = arith.constant 9.765625E-4 : f32
    %123 = vector.broadcast %cst_61 : f32 to vector<1x1xf32>
    %124 = arith.mulf %120, %123 : vector<1x1xf32>
    %125 = arith.mulf %122, %122 : vector<1x1xf32>
    %126 = arith.subf %124, %125 : vector<1x1xf32>
    %cst_62 = arith.constant 0.000000e+00 : f32
    %127 = vector.broadcast %cst_62 : f32 to vector<1x1xf32>
    %128 = arith.maximumf %126, %127 : vector<1x1xf32>
    %129 = vector.broadcast %122 : vector<1x1xf32> to vector<32x32xf32>
    %130 = arith.subf %111, %129 : vector<32x32xf32>
    %cst_63 = arith.constant 9.99999974E-6 : f32
    %131 = vector.broadcast %cst_63 : f32 to vector<1x1xf32>
    %132 = arith.addf %128, %131 : vector<1x1xf32>
    %133 = math.rsqrt %132 : vector<1x1xf32>
    %134 = vector.broadcast %133 : vector<1x1xf32> to vector<32x32xf32>
    %135 = arith.mulf %130, %134 : vector<32x32xf32>
    %cst_64 = arith.constant 0.000000e+00 : f32
    %136 = vector.broadcast %cst_64 : f32 to vector<32x32xf32>
    %137 = arith.cmpf ogt, %135, %136 : vector<32x32xf32>
    %cst_65 = arith.constant 0.00999999977 : f32
    %138 = vector.broadcast %cst_65 : f32 to vector<32x32xf32>
    %139 = arith.mulf %138, %135 : vector<32x32xf32>
    %140 = arith.select %137, %135, %139 : vector<32x32xi1>, vector<32x32xf32>
    %c0_66 = arith.constant 0 : index
    %c3 = arith.constant 3 : index
    %c0_67 = arith.constant 0 : index
    %c0_68 = arith.constant 0 : index
    %141 = vector.load %arg4[%c0_66, %c3, %c0_67, %c0_68] : memref<1x4x32x32xf32, #tpu.memory_space<vmem>>, vector<1x1x32x32xf32>
    %142 = vector.shape_cast %141 : vector<1x1x32x32xf32> to vector<32x32xf32>
    %143 = vector.shape_cast %140 : vector<32x32xf32> to vector<1x1x32x32xf32>
    tpu.vector_store %arg4[%c0_66, %c3, %c0_67, %c0_68], %143 {strides = array<i32>} : memref<1x4x32x32xf32, #tpu.memory_space<vmem>>, vector<1x1x32x32xf32>,
    return
  }
  func.func @transform_0(%arg0: i32) -> (i32, i32, i32) {
    %c0_i32 = arith.constant 0 : i32
    %c0_i32_0 = arith.constant 0 : i32
    %c0_i32_1 = arith.constant 0 : i32
    return %arg0, %c0_i32, %c0_i32_0 : i32, i32, i32
  }
  func.func @transform_1(%arg0: i32) -> (i32, i32) {
    %c0_i32 = arith.constant 0 : i32
    %c0_i32_0 = arith.constant 0 : i32
    %c0_i32_1 = arith.constant 0 : i32
    return %c0_i32, %c0_i32_0 : i32, i32
  }
  func.func @transform_2(%arg0: i32) -> (i32, i32) {
    %c0_i32 = arith.constant 0 : i32
    %c0_i32_0 = arith.constant 0 : i32
    %c0_i32_1 = arith.constant 0 : i32
    return %c0_i32, %c0_i32_0 : i32, i32
  }
  func.func @transform_3(%arg0: i32) -> (i32, i32, i32, i32) {
    %c0_i32 = arith.constant 0 : i32
    %c0_i32_0 = arith.constant 0 : i32
    %c0_i32_1 = arith.constant 0 : i32
    %c0_i32_2 = arith.constant 0 : i32
    return %arg0, %c0_i32, %c0_i32_0, %c0_i32_1 : i32, i32, i32, i32
  }
}

</mosaic_0001>

<bundles_post_ra>
// kernel: tpu_custom_call.1
= control target key start
LH: loop header
LB: loop body
LE: loop exit
PB: predicated region body
PF: predicated region fallthrough
CT: control target
= control target key end

     0   :  { %8 = vsyncpa [#allocation3], 0  ;;  %s1408_s0 = inlined_call_operand.vmem [shape: f32[2,64,16], index: 0, kind: input, shape index: {}]   ;;  %s1409_s1 = inlined_call_operand.vmem [shape: f32[16,32], index: 1, kind: input, shape index: {}]   ;;  %s1410_s2 = inlined_call_operand.vmem [shape: f32[32,16], index: 2, kind: input, shape index: {}]   ;;  %s1411_s3 = inlined_call_operand.hbm [shape: f32[2,4,32,32], index: 3, kind: output, shape index: {}]  }
   0x1   :  { %10 = vsyncpa [#allocation3 + $0x1], 0  ;;  %s1040_s12 = smov 0   ;;  %s1042_s13 = smov 0  }
   0x2   :  { %s1044_s14 = smov 0   ;;  %s1046_s15 = smov 0  }
   0x3 LB: > { %s1061_s16 = sadd.s32 4294967295, %s1016_s15   ;;  %s851_s17 = sadd.s32 4294967294, %s1016_s15   ;;  %s1016_s15 = sphi %s1046_s15, %s1417_s15   ;;  %s1012_s14 = sphi %s1044_s14, %s1416_s14   ;;  %s1008_s13 = sphi %s1042_s13, %s1415_s13   ;;  %s1004_s12 = sphi %s1040_s12, %s1414_s12  }
   0x4   : > { %s1065_s18 = sadd.s32 1, %s1016_s15   ;;  %s91_s19 = sadd.s32 1, %s1012_s14 }
   0x5   : > { %s88_s20 = ssub.s32 %s1016_s15, %s1065_s18  ;;  %p101_p0 = scmp.ne.s32.totalorder %s1012_s14, %s1008_s13 }
   0x6   : > { %p89_p1 = scmp.eq.s32.totalorder %s88_s20, 0  ;;  %p102_p2 = scmp.eq.s32.totalorder %s1061_s16, 1 }
   0x7   : > { %p107_p3 = scmp.ne.s32.totalorder %s1008_s13, %s1004_s12  ;;  %p108_p4 = scmp.eq.s32.totalorder %s851_s17, 1 }
   0x8   : > { %s1076_s21 = scalar_select %p89_p1, %s1012_s14, %s91_s19  }
   0x9   : > { %p1078_p5 = por %p102_p2, %p101_p0  ;;  %p1082_p6 = por %p108_p4, %p107_p3 }
   0xa   : > { %p854_p7 = scmp.ge.s32.totalorder %s1016_s15, 1  ;;  %p140_p8 = scmp.lt.s32.totalorder %s1016_s15, 3 }
   0xc   : > { %p141_p9 = pnand %p854_p7, %p140_p8 }
   0xd   : > { %p164_p10 = scmp.lt.s32.totalorder (!%p141_p9), %s1061_s16, 1  ;;  %s161_s20 = sand.u32 (!%p141_p9), 1, %s1008_s13  }
   0xe   : > { %144 = sbr.rel (%p141_p9) target bundleno = 549 (0x225), region = 32  ;;  %s855_s24 = sshll.u32 (!%p141_p9), %s161_s20, 7 }
   0xf   : > { %s1266_s25 = scalar_lea.vmem (!%p141_p9), [#allocation2], %s855_s24  ;;  %s900_s26 = sshll.u32 (!%p141_p9), %s1061_s16, 7 }
  0x10   : > { %s774_s4 = scalar_lea.sflag (!%p141_p9), [#allocation3], %s161_s20  ;;  %s974_s9 = scalar_lea.hbm (!%p141_p9), %s1411_s3, 256 }
  0x13   : > { %v178_v0 = vld [vmem:[%s1409_s1 + $0x8] sm:$0xff]  ;;  %v177_v1 = vld [vmem:[%s1409_s1] sm:$0xff]  ;;  %s165_s28 = scalar_select %p164_p10, %s1061_s16, 1  ;;  %vm179_vm0 = vcmask 130048   ;;  %v247_v14 = vld [vmem:[%s1410_s2 + $0x10] sm:$0xff]  ;;  %vm290_vm1 = vcmask 261120  }
  0x14   : > { %218 = vmatpush.msra.mxu0 %v178_v0  ;;  %901 = vmatpush.msra.mxu2 %v178_v0  ;;  %v245_v13 = vld [vmem:[%s1410_s2] sm:$0xff]  ;;  %v246_v17 = vld [vmem:[%s1410_s2 + $0x8] sm:$0xff]  ;;  %v248_v18 = vld [vmem:[%s1410_s2 + $0x18] sm:$0xff] }
  0x15   : > { %s899_s29 = sshll.u32 %s165_s28, 6  ;;  %s785_s28 = scalar_lea.hbm %s1411_s3, %s900_s26 }
  0x16   : > { %219 = vmatpush.msra.mxu0 %v177_v1  ;;  %902 = vmatpush.msra.mxu2 %v177_v1  ;;  %s168_s5 = scalar_lea.vmem %s1408_s0, %s899_s29  ;;  %s786_s29 = sshll.u32 %s1266_s25, 4  ;;  %s787_s29 = int_to_ptr.vmem [resolvable:$true] %s786_s29 }
  0x17   : > { %v169_v2 = vld [vmem:[%s168_s5] sm:$0xff]  ;;  %v175_v3 = vld [vmem:[%s168_s5 + $0x30] sm:$0xff]  ;;  %v170_v4 = vld [vmem:[%s168_s5 + $0x8] sm:$0xff]  ;;  %s788_s30 = sshll.u32 %s785_s28, 4  ;;  %s789_s30 = int_to_ptr.hbm [resolvable:$true] %s788_s30 }
  0x18   : > { %858 = vmatmul.msk.f32.vlgmr.msra.gmra.mxu0 %vm179_vm0, %v169_v2  ;;  %864 = vmatmul.msk.f32.vlgmr.msra.gmra.mxu2 %vm179_vm0, %v175_v3  ;;  %v176_v5 = vld [vmem:[%s168_s5 + $0x38] sm:$0xff]  ;;  %v171_v6 = vld [vmem:[%s168_s5 + $0x10] sm:$0xff]  ;;  %v173_v8 = vld [vmem:[%s168_s5 + $0x20] sm:$0xff] }
  0x19   : > { %v172_v7 = vld [vmem:[%s168_s5 + $0x18] sm:$0xff]  ;;  %v174_v9 = vld [vmem:[%s168_s5 + $0x28] sm:$0xff]  ;;  %s968_s5 = sshra.s32 %s789_s30, 4  ;;  %s969_s5 = int_to_ptr.hbm [resolvable:$true] %s968_s5 }
  0x1a   : > { %s970_s6 = scalar_lea.hbm %s969_s5, 128  ;;  %p975_p0 = scmp.lt.s32.totalorder %s969_s5, %s1411_s3 }
  0x1b   : > { %p971_p11 = scmp.ne.s32.totalorder %s969_s5, %s970_s6  ;;  %p976_p1 = scmp.lt.s32.totalorder %s974_s9, %s970_s6 }
  0x1d   : > { %p972_p12 = pnand %p971_p11, %p1078_p5  ;;  %p977_p2 = por %p976_p1, %p975_p0 }
  0x1f   : > { %p973_p13 = pneg %p972_p12 }
  0x20   : > { %859 = vmatmul.msk.f32.gmra.mxu0 %vm179_vm0, %v170_v4  ;;  %865 = vmatmul.msk.f32.gmra.mxu2 %vm179_vm0, %v176_v5 }
  0x21   : > { %p978_p3 = pnand %p977_p2, %p973_p13 }
  0x28   : > { %860 = vmatmul.msk.f32.gmra.mxu0 %vm179_vm0, %v171_v6 }
  0x30   : > { %861 = vmatmul.msk.f32.gmra.mxu0 %vm179_vm0, %v172_v7 }
  0x38   : > { %862 = vmatmul.msk.f32.gmra.mxu0 %vm179_vm0, %v173_v8 }
  0x40   : > { %863 = vmatmul.msk.f32.gmra.mxu0 %vm179_vm0, %v174_v9 }
  0x95   : > { %v221_v10 = vpop.f32.mrf.mxu0 }
  0x9b   : > { %v239_v11 = vpop.f32.mrf.mxu2 }
  0x9d   : > { %v224_v12 = vpop.f32.mrf.mxu0 }
  0x9e   : > { %275 = vmatpush.msra.mxu1 %v224_v12  ;;  %903 = vmatpush.msra.mxu3 %v224_v12 }
  0xa0   : > { %276 = vmatpush.msra.mxu1 %v221_v10  ;;  %904 = vmatpush.msra.mxu3 %v221_v10 }
  0xa1   : > { %866 = vmatmul.msk.f32.vlgmr.msra.gmra.mxu1 %vm179_vm0, %v245_v13  ;;  %868 = vmatmul.msk.f32.vlgmr.msra.gmra.mxu3 %vm179_vm0, %v247_v14 }
  0xa3   : > { %v242_v15 = vpop.f32.mrf.mxu2 }
  0xa4   : > { %671 = vmatpush.msrb.mxu1 %v242_v15 }
  0xa5   : > { %v227_v16 = vpop.f32.mrf.mxu0 }
  0xa6   : > { %672 = vmatpush.msrb.mxu1 %v239_v11 }
  0xa9   : > { %867 = vmatmul.msk.f32.gmra.mxu1 %vm179_vm0, %v246_v17  ;;  %869 = vmatmul.msk.f32.gmra.mxu3 %vm179_vm0, %v248_v18 }
  0xad   : > { %v230_v19 = vpop.f32.mrf.mxu0 }
  0xae   : > { %407 = vmatpush.msrb.mxu2 %v230_v19 }
  0xb0   : > { %408 = vmatpush.msrb.mxu2 %v227_v16 }
  0xb1   : > { %886 = vmatmul.msk.f32.vlgmr.msrb.gmra.mxu1 %vm179_vm0, %v245_v13  ;;  %870 = vmatmul.msk.f32.vlgmr.msrb.gmra.mxu2 %vm179_vm0, %v245_v13 }
  0xb5   : > { %v233_v20 = vpop.f32.mrf.mxu0 }
  0xb9   : > { %887 = vmatmul.msk.f32.gmra.mxu1 %vm179_vm0, %v246_v17  ;;  %871 = vmatmul.msk.f32.gmra.mxu2 %vm179_vm0, %v246_v17 }
  0xbd   : > { %v236_v21 = vpop.f32.mrf.mxu0 }
  0xbe   : > { %539 = vmatpush.msrb.mxu3 %v236_v21 }
  0xc0   : > { %540 = vmatpush.msrb.mxu3 %v233_v20 }
  0xc1   : > { %888 = vmatmul.msk.f32.gmra.mxu1 %vm179_vm0, %v247_v14  ;;  %878 = vmatmul.msk.f32.vlgmr.msrb.gmra.mxu3 %vm179_vm0, %v245_v13 }
  0xc2   : > { %872 = vmatmul.msk.f32.gmra.mxu2 %vm179_vm0, %v247_v14 }
  0xc9   : > { %879 = vmatmul.msk.f32.gmra.mxu3 %vm179_vm0, %v246_v17  ;;  %889 = vmatmul.msk.f32.gmra.mxu1 %vm179_vm0, %v248_v18 }
  0xca   : > { %873 = vmatmul.msk.f32.gmra.mxu2 %vm179_vm0, %v248_v18 }
  0xd1   : > { %880 = vmatmul.msk.f32.gmra.mxu3 %vm179_vm0, %v247_v14 }
  0xd9   : > { %881 = vmatmul.msk.f32.gmra.mxu3 %vm179_vm0, %v248_v18 }
 0x11e   : > { %v1135_v22 = vpop.f32.mrf.mxu1 }
 0x11f   : > { %v291_v23 = vsel %vm290_vm1, %v1135_v22, 0.0  ;;  %v312_v24 = vmul.f32 %v1135_v22, %v1135_v22 }
 0x120   : > { %292 = vadd.xlane.f32.xlu0 %v291_v23 }
 0x121   : > { %v316_v28 = vsel %vm290_vm1, %v312_v24, 0.0 }
 0x124   : > { %v1141_v25 = vpop.f32.mrf.mxu3 }
 0x125   : > { %v297_v26 = vsel %vm290_vm1, %v1141_v25, 0.0  ;;  %v314_v37 = vmul.f32 %v1141_v25, %v1141_v25 }
 0x126   : > { %v1145_v27 = vpop.f32.mrf.mxu1  ;;  %298 = vadd.xlane.f32.xlu2 %v297_v26 }
 0x127   : > { %v313_v29 = vmul.f32 %v1145_v27, %v1145_v27  ;;  %v294_v35 = vsel %vm290_vm1, %v1145_v27, 0.0  ;;  %v322_v40 = vsel %vm290_vm1, %v314_v37, 0.0 }
 0x128   : > { %317 = vadd.xlane.f32.xlu0 %v316_v28 }
 0x129   : > { %v319_v30 = vsel %vm290_vm1, %v313_v29, 0.0 }
 0x12a   : > { %320 = vadd.xlane.f32.xlu1 %v319_v30 }
 0x12c   : > { %v1151_v31 = vpop.f32.mrf.mxu3 }
 0x12d   : > { %v315_v32 = vmul.f32 %v1151_v31, %v1151_v31  ;;  %v300_v33 = vsel %vm290_vm1, %v1151_v31, 0.0 }
 0x12e   : > { %v1157_v34 = vpop.f32.mrf.mxu1  ;;  %301 = vadd.xlane.f32.xlu2 %v300_v33 }
 0x12f   : > { %v325_v36 = vsel %vm290_vm1, %v315_v32, 0.0  ;;  %v686_v44 = vsel %vm290_vm1, %v1157_v34, 0.0  ;;  %v707_v47 = vmul.f32 %v1157_v34, %v1157_v34 }
 0x130   : > { %295 = vadd.xlane.f32.xlu0 %v294_v35 }
 0x131   : > { %v711_v51 = vsel %vm290_vm1, %v707_v47, 0.0 }
 0x132   : > { %326 = vadd.xlane.f32.xlu1 %v325_v36 }
 0x134   : > { %v1164_v38 = vpop.f32.mrf.mxu2 }
 0x135   : > { %v422_v41 = vsel %vm290_vm1, %v1164_v38, 0.0  ;;  %v443_v54 = vmul.f32 %v1164_v38, %v1164_v38 }
 0x136   : > { %v1166_v39 = vpop.f32.mrf.mxu1 }
 0x137   : > { %v689_v46 = vsel %vm290_vm1, %v1166_v39, 0.0  ;;  %v708_v50 = vmul.f32 %v1166_v39, %v1166_v39  ;;  %v447_v57 = vsel %vm290_vm1, %v443_v54, 0.0 }
 0x138   : > { %323 = vadd.xlane.f32.xlu0 %v322_v40 }
 0x139   : > { %v714_v52 = vsel %vm290_vm1, %v708_v50, 0.0 }
 0x13a   : > { %423 = vadd.xlane.f32.xlu1 %v422_v41 }
 0x13c   : > { %v1177_v45 = vpop.f32.mrf.mxu2 }
 0x13d   : > { %v425_v58 = vsel %vm290_vm1, %v1177_v45, 0.0  ;;  %v444_v61 = vmul.f32 %v1177_v45, %v1177_v45 }
 0x13e   : > { %v1171_v42 = vpop.f32.mrf.mxu1 }
 0x13f   : > { %v692_v43 = vsel %vm290_vm1, %v1171_v42, 0.0  ;;  %v709_v59 = vmul.f32 %v1171_v42, %v1171_v42  ;;  %v450_v1 = vsel %vm290_vm1, %v444_v61, 0.0 }
 0x140   : > { %693 = vadd.xlane.f32.xlu2 %v692_v43  ;;  %687 = vadd.xlane.f32.xlu0 %v686_v44 }
 0x141   : > { %v717_v62 = vsel %vm290_vm1, %v709_v59, 0.0 }
 0x142   : > { %690 = vadd.xlane.f32.xlu1 %v689_v46 }
 0x144   : > { %v1183_v48 = vpop.f32.mrf.mxu3 }
 0x145   : > { %v554_v49 = vsel %vm290_vm1, %v1183_v48, 0.0  ;;  %v1191_v53 = vpop.f32.mrf.mxu2  ;;  %v575_v3 = vmul.f32 %v1183_v48, %v1183_v48 }
 0x146   : > { %v428_v55 = vsel %vm290_vm1, %v1191_v53, 0.0  ;;  %v445_v60 = vmul.f32 %v1191_v53, %v1191_v53  ;;  %v1213_v2 = vpop.f32.mrf.mxu1 }
 0x147   : > { %v695_v5 = vsel %vm290_vm1, %v1213_v2, 0.0  ;;  %v579_v6 = vsel %vm290_vm1, %v575_v3, 0.0  ;;  %v710_v19 = vmul.f32 %v1213_v2, %v1213_v2 }
 0x148   : > { %712 = vadd.xlane.f32.xlu0 %v711_v51  ;;  %555 = vadd.xlane.f32.xlu2 %v554_v49  ;;  %v453_v63 = vsel %vm290_vm1, %v445_v60, 0.0 }
 0x149   : > { %v720_v21 = vsel %vm290_vm1, %v710_v19, 0.0 }
 0x14a   : > { %715 = vadd.xlane.f32.xlu1 %v714_v52 }
 0x14c   : > { %v1197_v56 = vpop.f32.mrf.mxu3 }
 0x14d   : > { %v1217_v4 = vpop.f32.mrf.mxu2  ;;  %v576_v9 = vmul.f32 %v1197_v56, %v1197_v56  ;;  %v557_v11 = vsel %vm290_vm1, %v1197_v56, 0.0 }
 0x14e   : > { %v431_v7 = vsel %vm290_vm1, %v1217_v4, 0.0  ;;  %v446_v18 = vmul.f32 %v1217_v4, %v1217_v4 }
 0x14f   : > { %v582_v12 = vsel %vm290_vm1, %v576_v9, 0.0 }
 0x150   : > { %448 = vadd.xlane.f32.xlu0 %v447_v57  ;;  %429 = vadd.xlane.f32.xlu2 %v428_v55  ;;  %v456_v20 = vsel %vm290_vm1, %v446_v18, 0.0 }
 0x152   : > { %426 = vadd.xlane.f32.xlu1 %v425_v58 }
 0x154   : > { %v1210_v0 = vpop.f32.mrf.mxu3 }
 0x155   : > { %v577_v14 = vmul.f32 %v1210_v0, %v1210_v0  ;;  %v560_v16 = vsel %vm290_vm1, %v1210_v0, 0.0 }
 0x157   : > { %v585_v17 = vsel %vm290_vm1, %v577_v14, 0.0 }
 0x158   : > { %718 = vadd.xlane.f32.xlu0 %v717_v62  ;;  %454 = vadd.xlane.f32.xlu2 %v453_v63 }
 0x15a   : > { %451 = vadd.xlane.f32.xlu1 %v450_v1 }
 0x15c   : > { %v1224_v8 = vpop.f32.mrf.mxu3 }
 0x15d   : > { %v563_v10 = vsel %vm290_vm1, %v1224_v8, 0.0  ;;  %v578_v13 = vmul.f32 %v1224_v8, %v1224_v8 }
 0x15f   : > { %v588_v15 = vsel %vm290_vm1, %v578_v13, 0.0 }
 0x160   : > { %580 = vadd.xlane.f32.xlu0 %v579_v6  ;;  %696 = vadd.xlane.f32.xlu2 %v695_v5 }
 0x162   : > { %432 = vadd.xlane.f32.xlu1 %v431_v7 }
 0x168   : > { %558 = vadd.xlane.f32.xlu2 %v557_v11  ;;  %564 = vadd.xlane.f32.xlu0 %v563_v10 }
 0x16a   : > { %583 = vadd.xlane.f32.xlu1 %v582_v12 }
 0x170   : > { %561 = vadd.xlane.f32.xlu2 %v560_v16  ;;  %589 = vadd.xlane.f32.xlu0 %v588_v15 }
 0x172   : > { %586 = vadd.xlane.f32.xlu1 %v585_v17 }
 0x178   : > { %457 = vadd.xlane.f32.xlu2 %v456_v20 }
 0x17a   : > { %721 = vadd.xlane.f32.xlu1 %v720_v21 }
 0x193   : > { %v293_v23 = vpop.xlane.xlu0 %292 }
 0x199   : > { %v299_v28 = vpop.xlane.xlu2 %298 }
 0x19b   : > { %v318_v24 = vpop.xlane.xlu0 %317 }
 0x19d   : > { %v321_v26 = vpop.xlane.xlu1 %320 }
 0x19e   : > { %v328_v37 = vadd.f32 %v321_v26, %v318_v24 }
 0x1a1   : > { %v302_v35 = vpop.xlane.xlu2 %301 }
 0x1a3   : > { %v296_v29 = vpop.xlane.xlu0 %295 }
 0x1a4   : > { %v303_v30 = vadd.f32 %v296_v29, %v293_v23 }
 0x1a5   : > { %v327_v32 = vpop.xlane.xlu1 %326 }
 0x1a6   : > { %v304_v33 = vadd.f32 %v303_v30, %v299_v28 }
 0x1a8   : > { %v305_v36 = vadd.f32 %v304_v33, %v302_v35 }
 0x1aa   : > { %v306_v40 = vrot.slane %v305_v36, 4 }
 0x1ab   : > { %v324_v41 = vpop.xlane.xlu0 %323 }
 0x1ac   : > { %v307_v43 = vadd.f32 %v306_v40, %v305_v36  ;;  %v329_v44 = vadd.f32 %v328_v37, %v324_v41 }
 0x1ad   : > { %v424_v46 = vpop.xlane.xlu1 %423 }
 0x1ae   : > { %v308_v47 = vrot.slane %v307_v43, 2  ;;  %v330_v49 = vadd.f32 %v329_v44, %v327_v32 }
 0x1b0   : > { %v309_v50 = vadd.f32 %v308_v47, %v307_v43  ;;  %v331_v51 = vrot.slane %v330_v49, 4 }
 0x1b2   : > { %v310_v52 = vrot.slane %v309_v50, 1  ;;  %v332_v54 = vadd.f32 %v331_v51, %v330_v49 }
 0x1b3   : > { %v694_v55 = vpop.xlane.xlu2 %693  ;;  %v688_v57 = vpop.xlane.xlu0 %687 }
 0x1b4   : > { %v333_v58 = vrot.slane %v332_v54, 2  ;;  %v311_v59 = vadd.f32 %v310_v52, %v309_v50 }
 0x1b5   : > { %v691_v60 = vpop.xlane.xlu1 %690 }
 0x1b6   : > { %v334_v61 = vadd.f32 %v333_v58, %v332_v54  ;;  %v337_v62 = vmul.f32 0.0009765625, %v311_v59  ;;  %v698_v29 = vadd.f32 %v691_v60, %v688_v57 }
 0x1b8   : > { %v335_v63 = vrot.slane %v334_v61, 1  ;;  %v339_v6 = vmul.f32 %v337_v62, %v337_v62  ;;  %v342_v33 = vsub.f32 %v1135_v22, %v337_v62  ;;  %v343_v35 = vsub.f32 %v1145_v27, %v337_v62 }
 0x1b9   : > { %v344_v36 = vsub.f32 %v1141_v25, %v337_v62  ;;  %v345_v37 = vsub.f32 %v1151_v31, %v337_v62  ;;  %v699_v50 = vadd.f32 %v698_v29, %v694_v55 }
 0x1ba   : > { %v336_v1 = vadd.f32 %v335_v63, %v334_v61 }
 0x1bb   : > { %v1247_v3 = vpop.xlane.xlu0 %712  ;;  %v1249_v5 = vpop.xlane.xlu2 %555 }
 0x1bc   : > { %v338_v7 = vmul.f32 0.0009765625, %v336_v1 }
 0x1bd   : > { %v1251_v9 = vpop.xlane.xlu1 %715 }
 0x1be   : > { %v340_v10 = vsub.f32 %v338_v7, %v339_v6  ;;  %v723_v29 = vadd.f32 %v1251_v9, %v1247_v3 }
 0x1c0   : > { %v341_v11 = vmax.f32 %v340_v10, 0.0 }
 0x1c2   : > { %v346_v12 = vadd.f32 1e-05, %v341_v11 }
 0x1c3   : > { %v1253_v13 = vpop.xlane.xlu0 %448  ;;  %v430_v14 = vpop.xlane.xlu2 %429 }
 0x1c4   : > { %946 = vrsqrt.f32 %v346_v12  ;;  %vm353_vm3 = vweird.f32 %v346_v12 }
 0x1c5   : > { %v427_v15 = vpop.xlane.xlu1 %426 }
 0x1c6   : > { %v434_v30 = vadd.f32 %v427_v15, %v424_v46 }
 0x1c8   : > { %v435_v46 = vadd.f32 %v434_v30, %v430_v14 }
 0x1ca   : > { %v947_v16 = vpop.eup %946 }
 0x1cb   : > { %v1255_v17 = vpop.xlane.xlu0 %718  ;;  %v1257_v18 = vpop.xlane.xlu2 %454  ;;  %v348_v19 = vmul.f32 %v947_v16, %v346_v12  ;;  %vm354_vm2 = vweird.f32 %v947_v16 }
 0x1cc   : > { %vm355_vm4 = vmor %vm353_vm3, %vm354_vm2 }
 0x1cd   : > { %v452_v20 = vpop.xlane.xlu1 %451  ;;  %v349_v21 = vmul.f32 %v947_v16, %v348_v19 }
 0x1ce   : > { %v459_v15 = vadd.f32 %v452_v20, %v1253_v13 }
 0x1cf   : > { %v350_v23 = vmul.f32 0.5, %v349_v21 }
 0x1d1   : > { %v351_v24 = vsub.f32 1.5, %v350_v23 }
 0x1d3   : > { %v697_v26 = vpop.xlane.xlu2 %696  ;;  %v352_v28 = vmul.f32 %v947_v16, %v351_v24  ;;  %v581_v32 = vpop.xlane.xlu0 %580 }
 0x1d4   : > { %v700_v52 = vadd.f32 %v699_v50, %v697_v26 }
 0x1d5   : > { %v433_v40 = vpop.xlane.xlu1 %432  ;;  %v356_v41 = vsel %vm355_vm4, %v947_v16, %v352_v28 }
 0x1d6   : > { %v357_v43 = vmul.f32 %v356_v41, %v342_v33  ;;  %v358_v44 = vmul.f32 %v356_v41, %v343_v35  ;;  %v359_v47 = vmul.f32 %v356_v41, %v344_v36  ;;  %v360_v49 = vmul.f32 %v356_v41, %v345_v37 }
 0x1d7   : > { %v436_v51 = vadd.f32 %v435_v46, %v433_v40  ;;  %v701_v63 = vrot.slane %v700_v52, 4  ;;  %v724_v37 = vadd.f32 %v723_v29, %v1255_v17 }
 0x1d8   : > { %vm361_vm5 = vcmp.gt.f32.partialorder %v357_v43, 0.0  ;;  %vm362_vm6 = vcmp.gt.f32.partialorder %v358_v44, 0.0  ;;  %vm363_vm7 = vcmp.gt.f32.partialorder %v359_v47, 0.0  ;;  %vm364_vm8 = vcmp.gt.f32.partialorder %v360_v49, 0.0 }
 0x1d9   : > { %v365_v22 = vmul.f32 0.01, %v357_v43  ;;  %v366_v27 = vmul.f32 0.01, %v358_v44  ;;  %v367_v25 = vmul.f32 0.01, %v359_v47  ;;  %v702_v7 = vadd.f32 %v701_v63, %v700_v52 }
 0x1da   : > { %v368_v31 = vmul.f32 0.01, %v360_v49  ;;  %v437_v62 = vrot.slane %v436_v51, 4 }
 0x1db   : > { %v559_v54 = vpop.xlane.xlu2 %558  ;;  %v369_v57 = vsel %vm361_vm5, %v357_v43, %v365_v22  ;;  %v370_v58 = vsel %vm362_vm6, %v358_v44, %v366_v27  ;;  %v371_v59 = vsel %vm363_vm7, %v359_v47, %v367_v25  ;;  %v565_v60 = vpop.xlane.xlu0 %564  ;;  %v703_v21 = vrot.slane %v702_v7, 2 }
 0x1dc   : > { %v372_v61 = vsel %vm364_vm8, %v360_v49, %v368_v31  ;;  %373 = vst.msk [vmem:[%s1266_s25] sm:$0xff] %vm290_vm1, %v369_v57  ;;  %v438_v1 = vadd.f32 %v437_v62, %v436_v51  ;;  %v566_v6 = vadd.f32 %v559_v54, %v1249_v5  ;;  %v460_v5 = vadd.f32 %v459_v15, %v1257_v18 }
 0x1dd   : > { %v584_v55 = vpop.xlane.xlu1 %583  ;;  %374 = vst.msk [vmem:[%s1266_s25 + $0x8] sm:$0xff] %vm290_vm1, %v370_v58  ;;  %v704_v33 = vadd.f32 %v703_v21, %v702_v7 }
 0x1de   : > { %375 = vst.msk [vmem:[%s1266_s25 + $0x10] sm:$0xff] %vm290_vm1, %v371_v59  ;;  %v591_v12 = vadd.f32 %v584_v55, %v581_v32  ;;  %v439_v16 = vrot.slane %v438_v1, 2 }
 0x1df   : > { %376 = vst.msk [vmem:[%s1266_s25 + $0x18] sm:$0xff] %vm290_vm1, %v372_v61  ;;  %v705_v49 = vrot.slane %v704_v33, 1 }
 0x1e0   : > { %v440_v30 = vadd.f32 %v439_v16, %v438_v1 }
 0x1e1   : > { %v706_v31 = vadd.f32 %v705_v49, %v704_v33 }
 0x1e2   : > { %v441_v43 = vrot.slane %v440_v30, 1 }
 0x1e3   : > { %v562_v10 = vpop.xlane.xlu2 %561  ;;  %v590_v19 = vpop.xlane.xlu0 %589  ;;  %v1286_v62 = vmul.f32 0.0009765625, %v706_v31 }
 0x1e4   : > { %v567_v11 = vadd.f32 %v566_v6, %v562_v10  ;;  %v442_v27 = vadd.f32 %v441_v43, %v440_v30 }
 0x1e5   : > { %v587_v14 = vpop.xlane.xlu1 %586  ;;  %v738_v43 = vsub.f32 %v1166_v39, %v1286_v62 }
 0x1e6   : > { %v568_v23 = vadd.f32 %v567_v11, %v565_v60  ;;  %v592_v24 = vadd.f32 %v591_v12, %v587_v14  ;;  %v1284_v60 = vmul.f32 0.0009765625, %v442_v27 }
 0x1e8   : > { %v569_v26 = vrot.slane %v568_v23, 4  ;;  %v593_v28 = vadd.f32 %v592_v24, %v590_v19  ;;  %v470_v11 = vmul.f32 %v1284_v60, %v1284_v60  ;;  %v734_v19 = vmul.f32 %v1286_v62, %v1286_v62 }
 0x1ea   : > { %v570_v35 = vadd.f32 %v569_v26, %v568_v23  ;;  %v594_v36 = vrot.slane %v593_v28, 4 }
 0x1eb   : > { %v458_v32 = vpop.xlane.xlu2 %457 }
 0x1ec   : > { %v461_v13 = vadd.f32 %v460_v5, %v458_v32  ;;  %v571_v20 = vrot.slane %v570_v35, 2  ;;  %v595_v40 = vadd.f32 %v594_v36, %v593_v28 }
 0x1ed   : > { %v722_v41 = vpop.xlane.xlu1 %721 }
 0x1ee   : > { %v462_v44 = vrot.slane %v461_v13, 4  ;;  %v725_v47 = vadd.f32 %v724_v37, %v722_v41  ;;  %v572_v50 = vadd.f32 %v571_v20, %v570_v35  ;;  %v596_v46 = vrot.slane %v595_v40, 2 }
 0x1ef   : > { %v737_v41 = vsub.f32 %v1157_v34, %v1286_v62 }
 0x1f0   : > { %v463_v3 = vadd.f32 %v462_v44, %v461_v13  ;;  %v726_v9 = vrot.slane %v725_v47, 4  ;;  %v573_v22 = vrot.slane %v572_v50, 1  ;;  %v597_v18 = vadd.f32 %v596_v46, %v595_v40 }
 0x1f1   : > { %v739_v44 = vsub.f32 %v1171_v42, %v1286_v62 }
 0x1f2   : > { %v464_v25 = vrot.slane %v463_v3, 2  ;;  %v727_v51 = vadd.f32 %v726_v9, %v725_v47  ;;  %v574_v52 = vadd.f32 %v573_v22, %v572_v50  ;;  %v598_v17 = vrot.slane %v597_v18, 1 }
 0x1f3   : > { %v740_v47 = vsub.f32 %v1213_v2, %v1286_v62  ;;  %v474_v9 = vsub.f32 %v1177_v45, %v1284_v60  ;;  %v475_v22 = vsub.f32 %v1191_v53, %v1284_v60 }
 0x1f4   : > { %v465_v54 = vadd.f32 %v464_v25, %v463_v3  ;;  %v728_v57 = vrot.slane %v727_v51, 2  ;;  %v1282_v58 = vmul.f32 0.0009765625, %v574_v52  ;;  %v599_v59 = vadd.f32 %v598_v17, %v597_v18 }
 0x1f5   : > { %v473_v3 = vsub.f32 %v1164_v38, %v1284_v60 }
 0x1f6   : > { %v466_v61 = vrot.slane %v465_v54, 1  ;;  %v729_v55 = vadd.f32 %v728_v57, %v727_v51  ;;  %v602_v63 = vmul.f32 %v1282_v58, %v1282_v58  ;;  %v601_v1 = vmul.f32 0.0009765625, %v599_v59 }
 0x1f7   : > { %v605_v51 = vsub.f32 %v1183_v48, %v1282_v58  ;;  %v606_v31 = vsub.f32 %v1197_v56, %v1282_v58  ;;  %v607_v38 = vsub.f32 %v1210_v0, %v1282_v58  ;;  %v608_v45 = vsub.f32 %v1224_v8, %v1282_v58 }
 0x1f8   : > { %v467_v6 = vadd.f32 %v466_v61, %v465_v54  ;;  %v730_v7 = vrot.slane %v729_v55, 1  ;;  %v603_v10 = vsub.f32 %v601_v1, %v602_v63  ;;  %v476_v48 = vsub.f32 %v1217_v4, %v1284_v60 }
 0x1fa   : > { %v469_v12 = vmul.f32 0.0009765625, %v467_v6  ;;  %v731_v14 = vadd.f32 %v730_v7, %v729_v55  ;;  %v604_v15 = vmax.f32 %v603_v10, 0.0 }
 0x1fc   : > { %v471_v16 = vsub.f32 %v469_v12, %v470_v11  ;;  %v733_v21 = vmul.f32 0.0009765625, %v731_v14  ;;  %v609_v23 = vadd.f32 1e-05, %v604_v15 }
 0x1fe   : > { %v472_v24 = vmax.f32 %v471_v16, 0.0  ;;  %v735_v26 = vsub.f32 %v733_v21, %v734_v19  ;;  %948 = vrsqrt.f32 %v609_v23  ;;  %vm616_vm10 = vweird.f32 %v609_v23 }
 0x200   : > { %v477_v28 = vadd.f32 1e-05, %v472_v24  ;;  %v736_v29 = vmax.f32 %v735_v26, 0.0 }
 0x202   : > { %950 = vrsqrt.f32 %v477_v28  ;;  %v1294_v30 = vadd.f32 1e-05, %v736_v29  ;;  %vm484_vm13 = vweird.f32 %v477_v28 }
 0x204   : > { %952 = vrsqrt.f32 %v1294_v30  ;;  %v949_v5 = vpop.eup %948  ;;  %vm748_vm5 = vweird.f32 %v1294_v30 }
 0x205   : > { %v611_v33 = vmul.f32 %v949_v5, %v609_v23  ;;  %vm617_vm9 = vweird.f32 %v949_v5 }
 0x206   : > { %vm618_vm12 = vmor %vm616_vm10, %vm617_vm9 }
 0x207   : > { %v612_v36 = vmul.f32 %v949_v5, %v611_v33 }
 0x208   : > { %v951_v35 = vpop.eup %950 }
 0x209   : > { %v479_v32 = vmul.f32 %v951_v35, %v477_v28  ;;  %v613_v13 = vmul.f32 0.5, %v612_v36  ;;  %vm485_vm11 = vweird.f32 %v951_v35 }
 0x20a   : > { %v1297_v37 = vpop.eup %952  ;;  %vm486_vm14 = vmor %vm484_vm13, %vm485_vm11 }
 0x20b   : > { %v480_v20 = vmul.f32 %v951_v35, %v479_v32  ;;  %v743_v40 = vmul.f32 %v1297_v37, %v1294_v30  ;;  %v614_v49 = vsub.f32 1.5, %v613_v13  ;;  %vm749_vm15 = vweird.f32 %v1297_v37 }
 0x20c   : > { %vm750_vm9 = vmor %vm748_vm5, %vm749_vm15 }
 0x20d   : > { %v481_v50 = vmul.f32 0.5, %v480_v20  ;;  %v744_v46 = vmul.f32 %v1297_v37, %v743_v40  ;;  %v615_v18 = vmul.f32 %v949_v5, %v614_v49 }
 0x20f   : > { %v482_v27 = vsub.f32 1.5, %v481_v50  ;;  %v745_v25 = vmul.f32 0.5, %v744_v46  ;;  %v619_v53 = vsel %vm618_vm12, %v949_v5, %v615_v18 }
 0x210   : > { %v620_v54 = vmul.f32 %v619_v53, %v605_v51  ;;  %v621_v57 = vmul.f32 %v619_v53, %v606_v31  ;;  %v622_v59 = vmul.f32 %v619_v53, %v607_v38  ;;  %v623_v61 = vmul.f32 %v619_v53, %v608_v45 }
 0x211   : > { %v483_v52 = vmul.f32 %v951_v35, %v482_v27  ;;  %v746_v17 = vsub.f32 1.5, %v745_v25 }
 0x212   : > { %vm624_vm0 = vcmp.gt.f32.partialorder %v620_v54, 0.0  ;;  %vm625_vm2 = vcmp.gt.f32.partialorder %v621_v57, 0.0  ;;  %vm626_vm3 = vcmp.gt.f32.partialorder %v622_v59, 0.0  ;;  %vm627_vm4 = vcmp.gt.f32.partialorder %v623_v61, 0.0 }
 0x213   : > { %v487_v56 = vsel %vm486_vm14, %v951_v35, %v483_v52  ;;  %v747_v0 = vmul.f32 %v1297_v37, %v746_v17  ;;  %v628_v8 = vmul.f32 0.01, %v620_v54  ;;  %v629_v58 = vmul.f32 0.01, %v621_v57 }
 0x214   : > { %v630_v55 = vmul.f32 0.01, %v622_v59  ;;  %v488_v63 = vmul.f32 %v487_v56, %v473_v3  ;;  %v631_v1 = vmul.f32 0.01, %v623_v61  ;;  %v489_v6 = vmul.f32 %v487_v56, %v474_v9 }
 0x215   : > { %v490_v7 = vmul.f32 %v487_v56, %v475_v22  ;;  %v491_v4 = vmul.f32 %v487_v56, %v476_v48  ;;  %v632_v60 = vsel %vm624_vm0, %v620_v54, %v628_v8  ;;  %v633_v10 = vsel %vm625_vm2, %v621_v57, %v629_v58 }
 0x216   : > { %v634_v11 = vsel %vm626_vm3, %v622_v59, %v630_v55  ;;  %v635_v12 = vsel %vm627_vm4, %v623_v61, %v631_v1  ;;  %882 = vst.msk [vmem:[%s1266_s25 + $0x40] sm:$0xff] %vm290_vm1, %v632_v60  ;;  %vm492_vm6 = vcmp.gt.f32.partialorder %v488_v63, 0.0  ;;  %vm493_vm7 = vcmp.gt.f32.partialorder %v489_v6, 0.0 }
 0x217   : > { %vm494_vm8 = vcmp.gt.f32.partialorder %v490_v7, 0.0  ;;  %883 = vst.msk [vmem:[%s1266_s25 + $0x48] sm:$0xff] %vm290_vm1, %v633_v10  ;;  %vm495_vm10 = vcmp.gt.f32.partialorder %v491_v4, 0.0  ;;  %v496_v14 = vmul.f32 0.01, %v488_v63  ;;  %v751_v16 = vsel %vm750_vm9, %v1297_v37, %v747_v0 }
 0x218   : > { %v497_v15 = vmul.f32 0.01, %v489_v6  ;;  %884 = vst.msk [vmem:[%s1266_s25 + $0x50] sm:$0xff] %vm290_vm1, %v634_v11  ;;  %v498_v19 = vmul.f32 0.01, %v490_v7  ;;  %v752_v23 = vmul.f32 %v751_v16, %v737_v41  ;;  %v753_v24 = vmul.f32 %v751_v16, %v738_v43 }
 0x219   : > { %v499_v21 = vmul.f32 0.01, %v491_v4  ;;  %885 = vst.msk [vmem:[%s1266_s25 + $0x58] sm:$0xff] %vm290_vm1, %v635_v12  ;;  %v500_v26 = vsel %vm492_vm6, %v488_v63, %v496_v14  ;;  %v754_v34 = vmul.f32 %v751_v16, %v739_v44  ;;  %v755_v39 = vmul.f32 %v751_v16, %v740_v47 }
 0x21a   : > { %v501_v28 = vsel %vm493_vm7, %v489_v6, %v497_v15  ;;  %v502_v29 = vsel %vm494_vm8, %v490_v7, %v498_v19  ;;  %874 = vst.msk [vmem:[%s1266_s25 + $0x20] sm:$0xff] %vm290_vm1, %v500_v26  ;;  %vm756_vm11 = vcmp.gt.f32.partialorder %v752_v23, 0.0  ;;  %vm757_vm12 = vcmp.gt.f32.partialorder %v753_v24, 0.0 }
 0x21b   : > { %v503_v30 = vsel %vm495_vm10, %v491_v4, %v499_v21  ;;  %875 = vst.msk [vmem:[%s1266_s25 + $0x28] sm:$0xff] %vm290_vm1, %v501_v28  ;;  %vm758_vm13 = vcmp.gt.f32.partialorder %v754_v34, 0.0  ;;  %v760_v42 = vmul.f32 0.01, %v752_v23  ;;  %vm759_vm14 = vcmp.gt.f32.partialorder %v755_v39, 0.0 }
 0x21c   : > { %876 = vst.msk [vmem:[%s1266_s25 + $0x30] sm:$0xff] %vm290_vm1, %v502_v29  ;;  %v761_v2 = vmul.f32 0.01, %v753_v24  ;;  %v762_v62 = vmul.f32 0.01, %v754_v34 }
 0x21d   : > { %877 = vst.msk [vmem:[%s1266_s25 + $0x38] sm:$0xff] %vm290_vm1, %v503_v30  ;;  %v763_v5 = vmul.f32 0.01, %v755_v39  ;;  %v764_v33 = vsel %vm756_vm11, %v752_v23, %v760_v42 }
 0x21e   : > { %v765_v35 = vsel %vm757_vm12, %v753_v24, %v761_v2  ;;  %v766_v36 = vsel %vm758_vm13, %v754_v34, %v762_v62  ;;  %890 = vst.msk [vmem:[%s1266_s25 + $0x60] sm:$0xff] %vm290_vm1, %v764_v33 }
 0x21f   : > { %v767_v32 = vsel %vm759_vm14, %v755_v39, %v763_v5  ;;  %891 = vst.msk [vmem:[%s1266_s25 + $0x68] sm:$0xff] %vm290_vm1, %v765_v35 }
 0x220   : > { %892 = vst.msk [vmem:[%s1266_s25 + $0x70] sm:$0xff] %vm290_vm1, %v766_v36 }
 0x221   : > { %893 = vst.msk [vmem:[%s1266_s25 + $0x78] sm:$0xff] %vm290_vm1, %v767_v32 }
 0x222   : > { %981 = shalt.err (!%p978_p3)
}
 0x223   : > { %s1018_s17 = smov 128   ;;  %s1019_s19 = smov 8  }
 0x224   : > { %905 = dma.vmem_to_hbm [thread:$0]  (%p1078_p5), %s787_s29, 2048, %s789_s30, %s774_s4, %s1018_s17, %s1018_s17, %s1019_s19  }
 0x225 PF: > { %p911_p4 = scmp.ge.s32.totalorder %s1016_s15, 2  ;;  %s803_s20 = sand.u32 1, %s1004_s12  }
 0x226   : > { %s804_s24 = scalar_lea.sflag [#allocation3], %s803_s20 }
 0x227   : > { %p908_p7 = pnand %p911_p4, %p1082_p6 }
 0x229   : > { %p909_p8 = pneg %p908_p7 }
 0x22b   : > { %999 = dma.done.wait (%p909_p8), %s804_s24, 2048  }
 0x22c   : > { %1001 = vsyncadd (%p909_p8), %s804_s24, 4294965248  ;;  %p13_p9 = scmp.ge.s32.totalorder %s1065_s18, 4   ;;  %s1414_s12 = smov %s1008_s13 }
 0x22d   : > { %s1415_s13 = smov %s1012_s14  ;;  %s1416_s14 = smov %s1076_s21 }
 0x22e   : > { %s1417_s15 = smov %s1065_s18  ;;  %15 = sbr.rel (!%p13_p9) target bundleno = 3 (0x3), region = 70 }
 0x233   :  { %810 = vsyncpa [#allocation3], 1 }
 0x234   :  { %812 = vsyncpa [#allocation3 + $0x1], 1 }

</bundles_post_ra>
